<compile_context>
chip_gen: v5e
topology: v5e:2x2
jax: 0.10.0
libtpu: 0.0.40
codegen_flags: <defaults>
</compile_context>

<pallas_src>
import functools

import jax
import jax.numpy as jnp
from jax import lax
from jax.experimental import pallas as pl
from jax.experimental.pallas import tpu as pltpu


def _round_up(a, b):
    return (a + b - 1) // b * b


def _pick_batch_tile(b_pad, block_b):
    """Largest batch tile <= block_b (multiple of 128) giving an even grid."""
    tb = max(128, min(block_b, b_pad))
    tb = _round_up(tb, 128)
    steps = pl.cdiv(b_pad, tb)
    if b_pad >= 256 and steps % 2 == 1:
        # v7x megacore: make the ("parallel",) batch axis an even number of
        # steps so both TensorCores get work (best effort; 128-multiples only).
        steps += 1
        tb = _round_up(pl.cdiv(b_pad, steps), 128)
    return tb


def _ppo_policy_kernel(x_ref, w1_ref, w2_ref, w3_ref, b_ref, out_ref):
    """x_ref: [TB, in_dim] (f32, cast to bf16 in-kernel).

    Weights in native PyTorch [out, in] layout (w1/w2/w3 bf16).
    b_ref: packed f32 biases [hid + hid + n_act, 1].
    out_ref: [TB, n_act] f32 probabilities (softmax over axis 1).
    """
    hid = w1_ref.shape[0]
    n_act = out_ref.shape[1]

    # Static, sublane-aligned slices of the packed bias buffer (hid % 8 == 0).
    b1 = b_ref[0:hid, :]                      # [hid, 1]
    b2 = b_ref[hid:2 * hid, :]                # [hid, 1]
    b3 = b_ref[2 * hid:2 * hid + n_act, :]    # [n_act, 1]

    x = x_ref[...].astype(w1_ref.dtype)       # [TB, in_dim] bf16 (cast in-kernel)

    # linear1 + ReLU6:  h1^T = W1 . x^T  via NT contraction (contract the last
    # dims of both operands, the q.kT attention pattern) -> batch on lanes.
    a1 = lax.dot_general(w1_ref[...], x, (((1,), (1,)), ((), ())),
                         preferred_element_type=jnp.float32) + b1   # [hid, TB] f32
    h1 = jnp.clip(a1, 0.0, 6.0).astype(w2_ref.dtype)    # fused ReLU6 + downcast

    # linear2 + ReLU6 (standard NN matmul, lane-dense activations)
    a2 = jnp.dot(w2_ref[...], h1, preferred_element_type=jnp.float32) + b2
    h2 = jnp.clip(a2, 0.0, 6.0).astype(w3_ref.dtype)    # [hid, TB] bf16

    # policy head
    logits = jnp.dot(w3_ref[...], h2,
                     preferred_element_type=jnp.float32) + b3       # [n_act, TB]

    if n_act == 2:
        # softmax([l0, l1]) == [sigmoid(l0-l1), 1 - sigmoid(l0-l1)].
        # No cross-lane reductions; exp on EUP, approx reciprocal on EUP.
        # Clamp the gap so exp() never overflows into the approx reciprocal.
        d = jnp.clip(logits[1:2, :] - logits[0:1, :], -30.0, 30.0)   # [1, TB]
        p0 = pl.reciprocal(1.0 + jnp.exp(d), approx=True)            # sigmoid(l0-l1)
        probs = jnp.concatenate([p0, 1.0 - p0], axis=0)              # [2, TB]
    else:
        m = jnp.max(logits, axis=0, keepdims=True)
        e = jnp.exp(logits - m)
        probs = e * pl.reciprocal(jnp.sum(e, axis=0, keepdims=True), approx=True)

    # Relayout lane-dense [n_act, TB] -> consumer layout [TB, n_act]:
    # pad rows to a sublane multiple, transpose on the (idle) XLU, slice lanes.
    n_rows = _round_up(n_act, 8)
    if n_rows != n_act:
        probs = jnp.concatenate(
            [probs, jnp.zeros((n_rows - n_act, probs.shape[1]), probs.dtype)],
            axis=0)                                                   # [8, TB]
    out_ref[...] = probs.T[:, :n_act].astype(out_ref.dtype)          # [TB, n_act]


@functools.partial(jax.jit, static_argnames=("block_b", "compute_dtype"))
def ppo_policy_forward(x, params, *, block_b=8192, compute_dtype=jnp.bfloat16):
    """x: [B, in_dim] float32.  params: PyTorch-layout weights/biases.

    Returns [B, n_actions] float32 probabilities (rows sum to 1).
    block_b: batch-tile cap (multiple of 128).  8192 is v7x-safe with the
    default 32 MiB vmem limit; on v5e/v6e sweep up to 32768 and raise
    vmem_limit_bytes accordingly.
    """
    w1 = params["w1"].astype(compute_dtype)   # [hid, in]
    w2 = params["w2"].astype(compute_dtype)   # [hid, hid]
    w3 = params["w3"].astype(compute_dtype)   # [n_act, hid]
    b_packed = jnp.concatenate(
        [params["b1"], params["b2"], params["b3"]]).reshape(-1, 1).astype(jnp.float32)

    B, in_dim = x.shape
    n_act = w3.shape[0]
    assert block_b % 128 == 0

    # Pad the batch to a multiple of 128 only when needed (tiny / odd B).
    # When B is already 128-aligned we rely on Pallas ragged last blocks:
    # garbage rows only produce garbage in their own (discarded) output rows,
    # since all mixing is along the feature axis and softmax is per-column.
    B_pad = _round_up(B, 128)
    if B_pad != B:
        x = jnp.pad(x, ((0, B_pad - B), (0, 0)))

    TB = _pick_batch_tile(B_pad, block_b)
    grid = (pl.cdiv(B_pad, TB),)

    def resident(a):  # whole-array block, VMEM-resident across all grid steps
        nd = a.ndim
        return pl.BlockSpec(a.shape, lambda i, _nd=nd: (0,) * _nd)

    out = pl.pallas_call(
        _ppo_policy_kernel,
        out_shape=jax.ShapeDtypeStruct((B_pad, n_act), jnp.float32),
        grid=grid,
        in_specs=[
            pl.BlockSpec((TB, in_dim), lambda i: (i, 0)),   # x tile (pipelined)
            resident(w1), resident(w2), resident(w3), resident(b_packed),
        ],
        out_specs=pl.BlockSpec((TB, n_act), lambda i: (i, 0)),
        compiler_params=pltpu.CompilerParams(
            dimension_semantics=("parallel",),       # megacore batch sharding
            vmem_limit_bytes=32 * 1024 * 1024,       # explicit, v7x-safe
        ),
    )(x, w1, w2, w3, b_packed)

    return out[:B] if B_pad != B else out             # [B, n_act] f32


def init_params(key, in_dim, hid_dim, n_actions=2):
    """PyTorch nn.Linear layout ([out, in] weights), uniform(+/-1/sqrt(fan_in)) init."""
    ks = jax.random.split(key, 6)

    def lin(kw, kb, fan_in, fan_out):
        bound = 1.0 / jnp.sqrt(jnp.float32(fan_in))
        w = jax.random.uniform(kw, (fan_out, fan_in), jnp.float32, -bound, bound)
        b = jax.random.uniform(kb, (fan_out,), jnp.float32, -bound, bound)
        return w, b

    w1, b1 = lin(ks[0], ks[1], in_dim, hid_dim)
    w2, b2 = lin(ks[2], ks[3], hid_dim, hid_dim)
    w3, b3 = lin(ks[4], ks[5], hid_dim, n_actions)
    return {"w1": w1, "b1": b1, "w2": w2, "b2": b2, "w3": w3, "b3": b3}


def _ref_forward(x, p, compute_dtype=None):
    """Pure-JAX reference.  If compute_dtype is set, mirrors the kernel's bf16 casts."""
    relu6 = lambda v: jnp.clip(v, 0.0, 6.0)
    cast = (lambda a: a.astype(compute_dtype)) if compute_dtype is not None else (lambda a: a)
    h1 = relu6(jnp.dot(cast(x), cast(p["w1"]).T,
                       preferred_element_type=jnp.float32) + p["b1"])
    h2 = relu6(jnp.dot(cast(h1), cast(p["w2"]).T,
                       preferred_element_type=jnp.float32) + p["b2"])
    logits = jnp.dot(cast(h2), cast(p["w3"]).T,
                     preferred_element_type=jnp.float32) + p["b3"]
    return jax.nn.softmax(logits, axis=1)


if __name__ == "__main__":
    key = jax.random.PRNGKey(0)
    k_x, k_x2, k_p = jax.random.split(key, 3)

    B, in_dim, hid_dim, n_actions = 8, 16, 32, 2
    x = jax.random.normal(k_x, (B, in_dim), jnp.float32)
    params = init_params(k_p, in_dim, hid_dim, n_actions)

    out = jax.block_until_ready(ppo_policy_forward(x, params))
    assert out.shape == (B, n_actions)

    ref_bf16 = _ref_forward(x, params, compute_dtype=jnp.bfloat16)  # mirrors kernel numerics
    ref_f32 = _ref_forward(x, params)                               # original module semantics
    assert jnp.allclose(out, ref_bf16, atol=5e-3, rtol=5e-3)
    assert jnp.allclose(out, ref_f32, atol=5e-2)
    assert jnp.allclose(jnp.sum(out, axis=1), 1.0, atol=1e-5)

    # Multi-tile / padded-batch path (grid > 1, B not a multiple of 128).
    B2 = 300
    x2 = jax.random.normal(k_x2, (B2, in_dim), jnp.float32)
    out2 = jax.block_until_ready(ppo_policy_forward(x2, params, block_b=128))
    ref2 = _ref_forward(x2, params, compute_dtype=jnp.bfloat16)
    assert out2.shape == (B2, n_actions)
    assert jnp.allclose(out2, ref2, atol=5e-3, rtol=5e-3)
    assert jnp.allclose(jnp.sum(out2, axis=1), 1.0, atol=1e-5)

    print("KERNEL_OK")
</pallas_src>

<mosaic_0001>
module attributes {stable_mosaic.version = 11 : i64} {
  func.func @_ppo_policy_kernel(%arg0: i32, %arg1: memref<128x16xf32, #tpu.memory_space<vmem>>, %arg2: memref<32x16xbf16, #tpu.memory_space<vmem>>, %arg3: memref<32x32xbf16, #tpu.memory_space<vmem>>, %arg4: memref<2x32xbf16, #tpu.memory_space<vmem>>, %arg5: memref<66x1xf32, #tpu.memory_space<vmem>>, %arg6: memref<128x2xf32, #tpu.memory_space<vmem>>) attributes {dimension_semantics = [#tpu.dimension_semantics<parallel>], iteration_bounds = array<i64: 1>, scalar_prefetch = 0 : i64, scratch_operands = 0 : i64, tpu.core_type = #tpu.core_type<tc>, window_params = [{transform_indices = @transform_0, window_bounds = array<i64: 128, 16>}, {pipeline_mode = #tpu.pipeline_mode<synchronous>, transform_indices = @transform_1, window_bounds = array<i64: 32, 16>}, {pipeline_mode = #tpu.pipeline_mode<synchronous>, transform_indices = @transform_2, window_bounds = array<i64: 32, 32>}, {pipeline_mode = #tpu.pipeline_mode<synchronous>, transform_indices = @transform_3, window_bounds = array<i64: 2, 32>}, {pipeline_mode = #tpu.pipeline_mode<synchronous>, transform_indices = @transform_4, window_bounds = array<i64: 66, 1>}, {transform_indices = @transform_5, window_bounds = array<i64: 128, 2>}]} {
    %c0 = arith.constant 0 : index
    %c0_0 = arith.constant 0 : index
    %0 = vector.load %arg5[%c0, %c0_0] : memref<66x1xf32, #tpu.memory_space<vmem>>, vector<32x1xf32>
    %c32 = arith.constant 32 : index
    %c0_1 = arith.constant 0 : index
    %1 = vector.load %arg5[%c32, %c0_1] : memref<66x1xf32, #tpu.memory_space<vmem>>, vector<32x1xf32>
    %c64 = arith.constant 64 : index
    %c0_2 = arith.constant 0 : index
    %2 = vector.load %arg5[%c64, %c0_2] : memref<66x1xf32, #tpu.memory_space<vmem>>, vector<2x1xf32>
    %c0_3 = arith.constant 0 : index
    %c0_4 = arith.constant 0 : index
    %3 = vector.load %arg1[%c0_3, %c0_4] : memref<128x16xf32, #tpu.memory_space<vmem>>, vector<128x16xf32>
    %4 = arith.truncf %3 : vector<128x16xf32> to vector<128x16xbf16>
    %c0_5 = arith.constant 0 : index
    %c0_6 = arith.constant 0 : index
    %5 = vector.load %arg2[%c0_5, %c0_6] : memref<32x16xbf16, #tpu.memory_space<vmem>>, vector<32x16xbf16>
    %cst = arith.constant dense<0.000000e+00> : vector<32x128xf32>
    %6 = tpu.matmul %5, %4, %cst {dimension_numbers = #tpu.dot_dimension_numbers<[1], [1], [0], [0], [0, 0, 1, 0], [], []>} : vector<32x16xbf16>, vector<128x16xbf16>, vector<32x128xf32> -> vector<32x128xf32>
    %7 = vector.broadcast %0 : vector<32x1xf32> to vector<32x128xf32>
    %8 = arith.addf %6, %7 : vector<32x128xf32>
    %cst_7 = arith.constant 0.000000e+00 : f32
    %cst_8 = arith.constant 6.000000e+00 : f32
    %9 = vector.broadcast %cst_7 : f32 to vector<32x128xf32>
    %10 = arith.maximumf %9, %8 : vector<32x128xf32>
    %11 = vector.broadcast %cst_8 : f32 to vector<32x128xf32>
    %12 = arith.minimumf %11, %10 : vector<32x128xf32>
    %13 = arith.truncf %12 : vector<32x128xf32> to vector<32x128xbf16>
    %c0_9 = arith.constant 0 : index
    %c0_10 = arith.constant 0 : index
    %14 = vector.load %arg3[%c0_9, %c0_10] : memref<32x32xbf16, #tpu.memory_space<vmem>>, vector<32x32xbf16>
    %cst_11 = arith.constant dense<0.000000e+00> : vector<32x128xf32>
    %15 = tpu.matmul %14, %13, %cst_11 {dimension_numbers = #tpu.dot_dimension_numbers<[1], [0], [0], [1], [0, 0, 1, 1], [], []>} : vector<32x32xbf16>, vector<32x128xbf16>, vector<32x128xf32> -> vector<32x128xf32>
    %16 = vector.broadcast %1 : vector<32x1xf32> to vector<32x128xf32>
    %17 = arith.addf %15, %16 : vector<32x128xf32>
    %cst_12 = arith.constant 0.000000e+00 : f32
    %cst_13 = arith.constant 6.000000e+00 : f32
    %18 = vector.broadcast %cst_12 : f32 to vector<32x128xf32>
    %19 = arith.maximumf %18, %17 : vector<32x128xf32>
    %20 = vector.broadcast %cst_13 : f32 to vector<32x128xf32>
    %21 = arith.minimumf %20, %19 : vector<32x128xf32>
    %22 = arith.truncf %21 : vector<32x128xf32> to vector<32x128xbf16>
    %c0_14 = arith.constant 0 : index
    %c0_15 = arith.constant 0 : index
    %23 = vector.load %arg4[%c0_14, %c0_15] : memref<2x32xbf16, #tpu.memory_space<vmem>>, vector<2x32xbf16>
    %cst_16 = arith.constant dense<0.000000e+00> : vector<2x128xf32>
    %24 = tpu.matmul %23, %22, %cst_16 {dimension_numbers = #tpu.dot_dimension_numbers<[1], [0], [0], [1], [0, 0, 1, 1], [], []>} : vector<2x32xbf16>, vector<32x128xbf16>, vector<2x128xf32> -> vector<2x128xf32>
    %25 = vector.broadcast %2 : vector<2x1xf32> to vector<2x128xf32>
    %26 = arith.addf %24, %25 : vector<2x128xf32>
    %27 = vector.extract_strided_slice %26 {offsets = [1, 0], sizes = [1, 128], strides = [1, 1]} : vector<2x128xf32> to vector<1x128xf32>
    %28 = vector.extract_strided_slice %26 {offsets = [0, 0], sizes = [1, 128], strides = [1, 1]} : vector<2x128xf32> to vector<1x128xf32>
    %29 = arith.subf %27, %28 : vector<1x128xf32>
    %cst_17 = arith.constant -3.000000e+01 : f32
    %cst_18 = arith.constant 3.000000e+01 : f32
    %30 = vector.broadcast %cst_17 : f32 to vector<1x128xf32>
    %31 = arith.maximumf %30, %29 : vector<1x128xf32>
    %32 = vector.broadcast %cst_18 : f32 to vector<1x128xf32>
    %33 = arith.minimumf %32, %31 : vector<1x128xf32>
    %34 = math.exp %33 : vector<1x128xf32>
    %cst_19 = arith.constant 1.000000e+00 : f32
    %35 = vector.broadcast %cst_19 : f32 to vector<1x128xf32>
    %36 = arith.addf %35, %34 : vector<1x128xf32>
    %37 = tpu.reciprocal %36 {approx = true} : vector<1x128xf32> -> vector<1x128xf32>
    %cst_20 = arith.constant 1.000000e+00 : f32
    %38 = vector.broadcast %cst_20 : f32 to vector<1x128xf32>
    %39 = arith.subf %38, %37 : vector<1x128xf32>
    %40 = tpu.concatenate %37, %39 in 0 : vector<1x128xf32>, vector<1x128xf32> -> vector<2x128xf32>
    %cst_21 = arith.constant 0.000000e+00 : f32
    %41 = vector.broadcast %cst_21 : f32 to vector<6x128xf32>
    %42 = tpu.concatenate %40, %41 in 0 : vector<2x128xf32>, vector<6x128xf32> -> vector<8x128xf32>
    %43 = tpu.transpose %42, [1, 0] : vector<8x128xf32> -> vector<128x8xf32>
    %44 = vector.extract_strided_slice %43 {offsets = [0, 0], sizes = [128, 2], strides = [1, 1]} : vector<128x8xf32> to vector<128x2xf32>
    %c0_22 = arith.constant 0 : index
    %c0_23 = arith.constant 0 : index
    %45 = vector.load %arg6[%c0_22, %c0_23] : memref<128x2xf32, #tpu.memory_space<vmem>>, vector<128x2xf32>
    tpu.vector_store %arg6[%c0_22, %c0_23], %44 {strides = array<i32>} : memref<128x2xf32, #tpu.memory_space<vmem>>, vector<128x2xf32>,
    return
  }
  func.func @transform_0(%arg0: i32) -> (i32, i32) {
    %c0_i32 = arith.constant 0 : i32
    %c0_i32_0 = arith.constant 0 : i32
    return %arg0, %c0_i32 : i32, i32
  }
  func.func @transform_1(%arg0: i32) -> (i32, i32) {
    %c0_i32 = arith.constant 0 : i32
    %c0_i32_0 = arith.constant 0 : i32
    %c0_i32_1 = arith.constant 0 : i32
    return %c0_i32, %c0_i32_0 : i32, i32
  }
  func.func @transform_2(%arg0: i32) -> (i32, i32) {
    %c0_i32 = arith.constant 0 : i32
    %c0_i32_0 = arith.constant 0 : i32
    %c0_i32_1 = arith.constant 0 : i32
    return %c0_i32, %c0_i32_0 : i32, i32
  }
  func.func @transform_3(%arg0: i32) -> (i32, i32) {
    %c0_i32 = arith.constant 0 : i32
    %c0_i32_0 = arith.constant 0 : i32
    %c0_i32_1 = arith.constant 0 : i32
    return %c0_i32, %c0_i32_0 : i32, i32
  }
  func.func @transform_4(%arg0: i32) -> (i32, i32) {
    %c0_i32 = arith.constant 0 : i32
    %c0_i32_0 = arith.constant 0 : i32
    %c0_i32_1 = arith.constant 0 : i32
    return %c0_i32, %c0_i32_0 : i32, i32
  }
  func.func @transform_5(%arg0: i32) -> (i32, i32) {
    %c0_i32 = arith.constant 0 : i32
    %c0_i32_0 = arith.constant 0 : i32
    return %arg0, %c0_i32 : i32, i32
  }
}

</mosaic_0001>

<bundles_post_ra>
// kernel: ppo_policy_forward.1
= control target key start
LH: loop header
LB: loop body
LE: loop exit
PB: predicated region body
PF: predicated region fallthrough
CT: control target
= control target key end

     0   :  { %vm88_vm0 = vcmask 130048   ;;  %v354_v19 = vmov 0   ;;  %vm182_vm1 = vcmask 261120   ;;  %vm254_vm2 = vcmask 1040384   ;;  %s552_s0 = inlined_call_operand.vmem [shape: f32[128,16], index: 0, kind: input, shape index: {}]   ;;  %s553_s4 = inlined_call_operand.vmem [shape: f32[66,1], index: 4, kind: input, shape index: {}]   ;;  %s554_s1 = inlined_call_operand.vmem [shape: bf16[32,16], index: 1, kind: input, shape index: {}]   ;;  %s555_s2 = inlined_call_operand.vmem [shape: bf16[32,32], index: 2, kind: input, shape index: {}]   ;;  %s556_s3 = inlined_call_operand.vmem [shape: bf16[2,32], index: 3, kind: input, shape index: {}]   ;;  %s557_s5 = inlined_call_operand.vmem [shape: f32[128,2], index: 5, kind: output, shape index: {}]  }
   0x1   :  { %v44_v0 = vld [vmem:[%s552_s0 + $0x70] sm:$0xff]  ;;  %v45_v1 = vld [vmem:[%s552_s0 + $0x78] sm:$0xff]  ;;  %v42_v3 = vld [vmem:[%s552_s0 + $0x60] sm:$0xff]  ;;  %347 = vset.pattern.permute.xlu0 %v354_v19  ;;  %348 = vset.pattern.permute.xlu1 %v354_v19  ;;  %vm256_vm3 = vcmask 1041408   ;;  %vm290_vm4 = vcmask 15360  }
   0x2   :  { %v53_v2 = vpack.c.bf16 %v45_v1, %v44_v0  ;;  %v43_v4 = vld [vmem:[%s552_s0 + $0x68] sm:$0xff]  ;;  %v40_v8 = vld [vmem:[%s552_s0 + $0x50] sm:$0xff]  ;;  %v41_v9 = vld [vmem:[%s552_s0 + $0x58] sm:$0xff]  ;;  %349 = vset.pattern.permute.xlu2 %v354_v19 }
   0x3   :  { %v52_v6 = vpack.c.bf16 %v43_v4, %v42_v3  ;;  %v51_v10 = vpack.c.bf16 %v41_v9, %v40_v8  ;;  %v38_v12 = vld [vmem:[%s552_s0 + $0x40] sm:$0xff]  ;;  %v39_v13 = vld [vmem:[%s552_s0 + $0x48] sm:$0xff]  ;;  %v36_v16 = vld [vmem:[%s552_s0 + $0x30] sm:$0xff] }
   0x4   :  { %v117_v5 = vsel %vm88_vm0, %v53_v2, 0  ;;  %v50_v14 = vpack.c.bf16 %v39_v13, %v38_v12  ;;  %v37_v17 = vld [vmem:[%s552_s0 + $0x38] sm:$0xff]  ;;  %v34_v21 = vld [vmem:[%s552_s0 + $0x20] sm:$0xff]  ;;  %v35_v22 = vld [vmem:[%s552_s0 + $0x28] sm:$0xff] }
   0x5   :  { %337 = vmatpush.bf16.xpose.msra.mxu3 %v117_v5  ;;  %119 = vmatpush.bf16.xpose.msra.mxu0 %v117_v5  ;;  %v114_v7 = vsel %vm88_vm0, %v52_v6, 0  ;;  %v111_v11 = vsel %vm88_vm0, %v51_v10, 0  ;;  %v49_v18 = vpack.c.bf16 %v37_v17, %v36_v16  ;;  %v23_v23 = vld [vmem:[%s553_s4 + $0x10] sm:$0xff]  ;;  %v21_v24 = vld [vmem:[%s553_s4] sm:$0xff]  ;;  %v48_v25 = vpack.c.bf16 %v35_v22, %v34_v21  ;;  %v33_v28 = vld [vmem:[%s552_s0 + $0x18] sm:$0xff] }
   0x6   :  { %v108_v15 = vsel %vm88_vm0, %v50_v14, 0  ;;  %70 = vperm.xlu0 %347, %v23_v23   ;;  %60 = vperm.xlu1 %348, %v21_v24   ;;  %v32_v27 = vld [vmem:[%s552_s0 + $0x10] sm:$0xff]  ;;  %v24_v29 = vld [vmem:[%s553_s4 + $0x18] sm:$0xff]  ;;  %v22_v30 = vld [vmem:[%s553_s4 + $0x8] sm:$0xff] }
   0x7   :  { %v105_v20 = vsel %vm88_vm0, %v49_v18, 0  ;;  %v102_v26 = vsel %vm88_vm0, %v48_v25, 0  ;;  %v47_v31 = vpack.c.bf16 %v33_v28, %v32_v27  ;;  %v30_v33 = vld [vmem:[%s552_s0] sm:$0xff]  ;;  %v31_v34 = vld [vmem:[%s552_s0 + $0x8] sm:$0xff]  ;;  %v27_v52 = vld [vmem:[%s553_s4 + $0x30] sm:$0xff] }
   0x8   :  { %v25_v35 = vld [vmem:[%s553_s4 + $0x20] sm:$0xff]  ;;  %v26_v36 = vld [vmem:[%s553_s4 + $0x28] sm:$0xff]  ;;  %v46_v37 = vpack.c.bf16 %v31_v34, %v30_v33  ;;  %164 = vperm.xlu2 %349, %v27_v52   ;;  %v28_v60 = vld [vmem:[%s553_s4 + $0x38] sm:$0xff] }
   0x9   :  { %v99_v32 = vsel %vm88_vm0, %v47_v31, 0  ;;  %v334_v39 = vld [vmem:[%s554_s1 + $0x8] sm:$0xff]  ;;  %v333_v40 = vld [vmem:[%s554_s1] sm:$0xff] }
   0xa   :  { %v96_v38 = vsel %vm88_vm0, %v46_v37, 0  ;;  %v335_v1 = vld [vmem:[%s555_s2] sm:$0xff]  ;;  %v336_v3 = vld [vmem:[%s555_s2 + $0x8] sm:$0xff] }
   0xb   :  { %v29_v2 = vld [vmem:[%s553_s4 + $0x40] sm:$0x3] }
   0xd   :  { %338 = vmatpush.bf16.xpose.msra.mxu3 %v114_v7  ;;  %120 = vmatpush.bf16.xpose.msra.mxu0 %v114_v7 }
   0xe   :  { %75 = vperm.xlu0 %347, %v24_v29   ;;  %65 = vperm.xlu1 %348, %v22_v30  }
  0x10   :  { %169 = vperm.xlu2 %349, %v28_v60  }
  0x15   :  { %339 = vmatpush.bf16.xpose.msra.mxu3 %v111_v11  ;;  %121 = vmatpush.bf16.xpose.msra.mxu0 %v111_v11 }
  0x16   :  { %154 = vperm.xlu0 %347, %v25_v35   ;;  %159 = vperm.xlu1 %348, %v26_v36  }
  0x18   :  { %221 = vperm.xlu2 %349, %v29_v2  }
  0x1d   :  { %340 = vmatpush.bf16.xpose.msra.mxu3 %v108_v15  ;;  %122 = vmatpush.bf16.xpose.msra.mxu0 %v108_v15 }
  0x25   :  { %341 = vmatpush.bf16.xpose.msra.mxu3 %v105_v20  ;;  %123 = vmatpush.bf16.xpose.msra.mxu0 %v105_v20 }
  0x2d   :  { %342 = vmatpush.bf16.xpose.msra.mxu3 %v102_v26  ;;  %124 = vmatpush.bf16.xpose.msra.mxu0 %v102_v26  ;;  %v218_v26 = vld [vmem:[%s556_s3] sm:$0x1] }
  0x35   :  { %343 = vmatpush.bf16.xpose.msra.mxu3 %v99_v32  ;;  %125 = vmatpush.bf16.xpose.msra.mxu0 %v99_v32 }
  0x3d   :  { %344 = vmatpush.bf16.xpose.msra.mxu3 %v96_v38  ;;  %126 = vmatpush.bf16.xpose.msra.mxu0 %v96_v38 }
  0x44   :  { %320 = vmatmul.msk.bf16.vlgmr.msra.gmra.mxu3 %vm88_vm0, %v334_v39  ;;  %319 = vmatmul.msk.bf16.vlgmr.msra.gmra.mxu0 %vm88_vm0, %v333_v40 }
  0x62   :  { %v165_v6 = vpop.permute.xlu2 %164 }
  0x6a   :  { %v170_v12 = vpop.permute.xlu2 %169 }
  0x72   :  { %v222_v27 = vpop.permute.xlu2 %221 }
  0x78   :  { %v61_v42 = vpop.permute.xlu1 %60  ;;  %v71_v43 = vpop.permute.xlu0 %70 }
  0x80   :  { %v66_v47 = vpop.permute.xlu1 %65  ;;  %v76_v50 = vpop.permute.xlu0 %75 }
  0x88   :  { %v160_v9 = vpop.permute.xlu1 %159  ;;  %v155_v10 = vpop.permute.xlu0 %154 }
  0xc1   :  { %v128_v41 = vpop.f32.mrf.mxu0 }
  0xc2   :  { %v129_v48 = vadd.f32 %v128_v41, %v61_v42 }
  0xc4   :  { %v138_v55 = vmax.f32 %v129_v48, 0.0 }
  0xc6   :  { %v142_v61 = vmin.f32 %v138_v55, 6.0 }
  0xc7   :  { %v133_v44 = vpop.f32.mrf.mxu3 }
  0xc8   :  { %v134_v46 = vadd.f32 %v133_v44, %v71_v43 }
  0xc9   :  { %v130_v45 = vpop.f32.mrf.mxu0 }
  0xca   :  { %v131_v49 = vadd.f32 %v130_v45, %v66_v47  ;;  %v140_v53 = vmax.f32 %v134_v46, 0.0 }
  0xcc   :  { %v139_v56 = vmax.f32 %v131_v49, 0.0  ;;  %v144_v58 = vmin.f32 %v140_v53, 6.0 }
  0xce   :  { %v143_v62 = vmin.f32 %v139_v56, 6.0 }
  0xcf   :  { %v135_v51 = vpop.f32.mrf.mxu3 }
  0xd0   :  { %v136_v54 = vadd.f32 %v135_v51, %v76_v50  ;;  %v146_v0 = vpack.c.bf16 %v143_v62, %v142_v61 }
  0xd2   :  { %v141_v57 = vmax.f32 %v136_v54, 0.0 }
  0xd4   :  { %v145_v59 = vmin.f32 %v141_v57, 6.0 }
  0xd6   :  { %v147_v63 = vpack.c.bf16 %v145_v59, %v144_v58 }
  0xd8   :  { %195 = vmatpush.bf16.msra.mxu1 %v147_v63 }
  0xdc   :  { %196 = vmatpush.bf16.msra.mxu1 %v146_v0 }
  0xdf   :  { %329 = vmatmul.msk.bf16.vlgmr.msra.gmra.mxu1 %vm182_vm1, %v335_v1 }
  0xef   :  { %330 = vmatmul.msk.bf16.gmra.mxu1 %vm182_vm1, %v336_v3 }
 0x15c   :  { %v198_v4 = vpop.f32.mrf.mxu1 }
 0x15d   :  { %v199_v14 = vadd.f32 %v198_v4, %v155_v10 }
 0x15f   :  { %v208_v19 = vmax.f32 %v199_v14, 0.0 }
 0x161   :  { %v212_v24 = vmin.f32 %v208_v19, 6.0 }
 0x164   :  { %v200_v5 = vpop.f32.mrf.mxu1 }
 0x165   :  { %v201_v11 = vadd.f32 %v200_v5, %v160_v9 }
 0x167   :  { %v209_v17 = vmax.f32 %v201_v11, 0.0 }
 0x169   :  { %v213_v22 = vmin.f32 %v209_v17, 6.0 }
 0x16b   :  { %v216_v25 = vpack.c.bf16 %v213_v22, %v212_v24 }
 0x16c   :  { %v203_v7 = vpop.f32.mrf.mxu1 }
 0x16d   :  { %v204_v8 = vadd.f32 %v203_v7, %v165_v6 }
 0x16f   :  { %v210_v15 = vmax.f32 %v204_v8, 0.0 }
 0x171   :  { %v214_v20 = vmin.f32 %v210_v15, 6.0 }
 0x174   :  { %v205_v13 = vpop.f32.mrf.mxu1 }
 0x175   :  { %v206_v16 = vadd.f32 %v205_v13, %v170_v12 }
 0x177   :  { %v211_v18 = vmax.f32 %v206_v16, 0.0 }
 0x179   :  { %v215_v21 = vmin.f32 %v211_v18, 6.0 }
 0x17b   :  { %v217_v23 = vpack.c.bf16 %v215_v21, %v214_v20 }
 0x17d   :  { %233 = vmatpush.bf16.msra.mxu2 %v217_v23 }
 0x181   :  { %234 = vmatpush.bf16.msra.mxu2 %v216_v25 }
 0x184   :  { %331 = vmatmul.msk.bf16.vlgmr.msra.gmra.mxu2 %vm182_vm1, %v218_v26 }
 0x207   :  { %v236_v28 = vpop.f32.mrf.mxu2 }
 0x208   :  { %v237_v29 = vadd.f32 %v236_v28, %v222_v27 }
 0x20a   :  { %v241_v30 = vrot.slane %v237_v29, 7 }
 0x20c   :  { %v243_v31 = vsub.f32 %v237_v29, %v241_v30 }
 0x20e   :  { %v332_v32 = vclamps-f32 %v243_v31, 30.0 }
 0x20f   :  { %v238_v33 = vpop.f32.mrf.mxu2 }
 0x210   :  { %v246_v34 = vmul.f32 1.442695, %v332_v32 }
 0x212   :  { %350 = vpow2.f32 %v246_v34 }
 0x218   :  { %v351_v35 = vpop.eup %350 }
 0x219   :  { %v248_v36 = vadd.f32 1.0, %v351_v35 }
 0x21b   :  { %352 = vrcp.f32 %v248_v36 }
 0x221   :  { %v353_v37 = vpop.eup %352 }
 0x222   :  { %v250_v38 = vsub.f32 1.0, %v353_v37  ;;  %v252_v39 = vrot.slane %v353_v37, 1 }
 0x224   :  { %v255_v40 = vsel %vm254_vm2, %v252_v39, %v250_v38 }
 0x225   :  { %v257_v41 = vsel %vm256_vm3, %v255_v40, 0.0 }
 0x226   :  { %258 = vxpose.xlu0.b32.start.end [1/1] (short) %v257_v41, 128 }
 0x2ca   :  { %v274_v42 = vpop.trf.xlu0 }
 0x2cb   :  { %291 = vst.msk [vmem:[%s557_s5] sm:$0xff] %vm290_vm4, %v274_v42 }
 0x2d2   :  { %v275_v43 = vpop.trf.xlu0 }
 0x2d3   :  { %292 = vst.msk [vmem:[%s557_s5 + $0x8] sm:$0xff] %vm290_vm4, %v275_v43 }
 0x2da   :  { %v276_v44 = vpop.trf.xlu0 }
 0x2db   :  { %293 = vst.msk [vmem:[%s557_s5 + $0x10] sm:$0xff] %vm290_vm4, %v276_v44 }
 0x2e2   :  { %v277_v45 = vpop.trf.xlu0 }
 0x2e3   :  { %294 = vst.msk [vmem:[%s557_s5 + $0x18] sm:$0xff] %vm290_vm4, %v277_v45 }
 0x2ea   :  { %v278_v46 = vpop.trf.xlu0 }
 0x2eb   :  { %295 = vst.msk [vmem:[%s557_s5 + $0x20] sm:$0xff] %vm290_vm4, %v278_v46 }
 0x2f2   :  { %v279_v47 = vpop.trf.xlu0 }
 0x2f3   :  { %296 = vst.msk [vmem:[%s557_s5 + $0x28] sm:$0xff] %vm290_vm4, %v279_v47 }
 0x2fa   :  { %v280_v48 = vpop.trf.xlu0 }
 0x2fb   :  { %297 = vst.msk [vmem:[%s557_s5 + $0x30] sm:$0xff] %vm290_vm4, %v280_v48 }
 0x302   :  { %v281_v49 = vpop.trf.xlu0 }
 0x303   :  { %298 = vst.msk [vmem:[%s557_s5 + $0x38] sm:$0xff] %vm290_vm4, %v281_v49 }
 0x30a   :  { %v282_v50 = vpop.trf.xlu0 }
 0x30b   :  { %299 = vst.msk [vmem:[%s557_s5 + $0x40] sm:$0xff] %vm290_vm4, %v282_v50 }
 0x312   :  { %v283_v51 = vpop.trf.xlu0 }
 0x313   :  { %300 = vst.msk [vmem:[%s557_s5 + $0x48] sm:$0xff] %vm290_vm4, %v283_v51 }
 0x31a   :  { %v284_v52 = vpop.trf.xlu0 }
 0x31b   :  { %301 = vst.msk [vmem:[%s557_s5 + $0x50] sm:$0xff] %vm290_vm4, %v284_v52 }
 0x322   :  { %v285_v53 = vpop.trf.xlu0 }
 0x323   :  { %302 = vst.msk [vmem:[%s557_s5 + $0x58] sm:$0xff] %vm290_vm4, %v285_v53 }
 0x32a   :  { %v286_v54 = vpop.trf.xlu0 }
 0x32b   :  { %303 = vst.msk [vmem:[%s557_s5 + $0x60] sm:$0xff] %vm290_vm4, %v286_v54 }
 0x332   :  { %v287_v55 = vpop.trf.xlu0 }
 0x333   :  { %304 = vst.msk [vmem:[%s557_s5 + $0x68] sm:$0xff] %vm290_vm4, %v287_v55 }
 0x33a   :  { %v288_v56 = vpop.trf.xlu0 }
 0x33b   :  { %305 = vst.msk [vmem:[%s557_s5 + $0x70] sm:$0xff] %vm290_vm4, %v288_v56 }
 0x342   :  { %v289_v57 = vpop.trf.xlu0 }
 0x343   :  { %306 = vst.msk [vmem:[%s557_s5 + $0x78] sm:$0xff] %vm290_vm4, %v289_v57 }

</bundles_post_ra>
